<compile_context>
chip_gen: v7x
topology: tpu7x:2x2x1
jax: 0.10.0
libtpu: 0.0.40
codegen_flags: <defaults>
</compile_context>

<pallas_src>
from dataclasses import dataclass

import jax
import jax.numpy as jnp
from jax.experimental import pallas as pl
from jax.experimental.pallas import tpu as pltpu


# ----------------------------- tiling helpers -----------------------------

_VMEM_LIMIT = 48 * 1024 * 1024  # conservative for v7x (64 MiB physical), fine on v5e/v6e


def _choose_row_tile(m, target=256):
    """Largest tile <= target that divides m (multiple of 16 so bf16/f32 sublane tiling holds).
    If m itself is small, use the whole extent (block == full dim is always legal)."""
    if m <= target:
        return m
    for tm in range(target, 15, -16):
        if m % tm == 0:
            return tm
    return m


# ----------------------------- Pallas kernels -----------------------------

def _encoder_kernel(tok_ref, ew_ref, eb_ref, qw_ref, qb_ref, quant_ref):
    # TODO(synk): the llamagen CNN Encoder (ResNet blocks + attention, ch_mult=[1,1,2,2,4]) is an
    # external dependency not given in the snippet; replaced by a single stride-16 patchify
    # projection preserving its I/O contract (B,3,H,W) -> (B, z_channels, H/16, W/16).
    h = jnp.dot(tok_ref[...], ew_ref[...], preferred_element_type=jnp.float32)
    h = h + eb_ref[...]                                   # f32 epilogue (v5e-safe)
    # quant_conv = nn.Conv2d(z_channels, codebook_embed_dim, 1)  (per-pixel linear), fused:
    q = jnp.dot(h.astype(jnp.bfloat16), qw_ref[...], preferred_element_type=jnp.float32)
    quant_ref[...] = q + qb_ref[...]


def pallas_encode_tokens(tok, enc_w, enc_b, quant_w, quant_b):
    """Fused encoder + quant_conv over token-major tokens. tok: (M, Dp) bf16 -> (M, E) f32."""
    M, Dp = tok.shape
    Zc = enc_w.shape[1]
    E = quant_w.shape[1]
    tm = _choose_row_tile(M)
    grid = (M // tm,)
    cost = pl.CostEstimate(
        flops=2 * M * Dp * Zc + 2 * M * Zc * E,
        transcendentals=0,
        bytes_accessed=tok.size * 2 + enc_w.size * 2 + quant_w.size * 2 + M * E * 4,
    )
    return pl.pallas_call(
        _encoder_kernel,
        out_shape=jax.ShapeDtypeStruct((M, E), jnp.float32),
        grid=grid,
        in_specs=[
            pl.BlockSpec((tm, Dp), lambda i: (i, 0)),     # token tile
            pl.BlockSpec((Dp, Zc), lambda i: (0, 0)),     # enc_w   (bf16, resident)
            pl.BlockSpec((1, Zc), lambda i: (0, 0)),      # enc_b
            pl.BlockSpec((Zc, E), lambda i: (0, 0)),      # quant_w (bf16, resident)
            pl.BlockSpec((1, E), lambda i: (0, 0)),       # quant_b
        ],
        out_specs=pl.BlockSpec((tm, E), lambda i: (i, 0)),
        compiler_params=pltpu.CompilerParams(
            dimension_semantics=("parallel",),
            vmem_limit_bytes=_VMEM_LIMIT,
        ),
        cost_estimate=cost,
    )(tok, enc_w, enc_b.reshape(1, Zc), quant_w, quant_b.reshape(1, E))


def _cond_kernel(tf_ref, tw_ref, tb_ref, yp_ref, yw_ref, yb_ref, cond_ref):
    # cond = SiLU(t_feat @ t_w + t_b) + SiLU(y_pool @ y_w + y_b)   (B rows only -> single block)
    te = jnp.dot(tf_ref[...], tw_ref[...], preferred_element_type=jnp.float32) + tb_ref[...]
    te = te * jax.nn.sigmoid(te)
    ye = jnp.dot(yp_ref[...], yw_ref[...], preferred_element_type=jnp.float32) + yb_ref[...]
    ye = ye * jax.nn.sigmoid(ye)
    cond_ref[...] = te + ye


def pallas_conditioning(t_feat, t_w, t_b, y_pool, y_w, y_b):
    B, F2 = t_feat.shape
    E = y_pool.shape[1]
    Hd = t_w.shape[1]
    return pl.pallas_call(
        _cond_kernel,
        out_shape=jax.ShapeDtypeStruct((B, Hd), jnp.float32),
        grid=(1,),
        in_specs=[
            pl.BlockSpec((B, F2), lambda i: (0, 0)),
            pl.BlockSpec((F2, Hd), lambda i: (0, 0)),
            pl.BlockSpec((1, Hd), lambda i: (0, 0)),
            pl.BlockSpec((B, E), lambda i: (0, 0)),
            pl.BlockSpec((E, Hd), lambda i: (0, 0)),
            pl.BlockSpec((1, Hd), lambda i: (0, 0)),
        ],
        out_specs=pl.BlockSpec((B, Hd), lambda i: (0, 0)),
    )(t_feat, t_w, t_b.reshape(1, Hd), y_pool, y_w, y_b.reshape(1, Hd))


def _decoder_loss_kernel(t_ref, x_ref, n_ref, cond_ref,
                         w1_ref, b1_ref, w2_ref, b2_ref, loss_ref):
    b = pl.program_id(0)
    t = t_ref[b]                                   # per-batch scalar from SMEM
    x = x_ref[0]                                   # (Tt, Dp) f32 token tile of the image
    n = n_ref[0]                                   # (Tt, Dp) f32 token tile of the noise
    # SILoss, path_type='linear', prediction='v':
    #   model_input = (1-t) x + t n ; model_target = n - x
    x_in = (1.0 - t) * x + t * n
    target = n - x
    # TODO(synk): full SiT is a stack of adaLN transformer blocks (external dep); stand-in keeps
    # the SILoss contract with one fused conditioned MLP (cond added per batch, no token repeat).
    h = jnp.dot(x_in.astype(jnp.bfloat16), w1_ref[...], preferred_element_type=jnp.float32)
    h = h + b1_ref[...] + cond_ref[0]              # (Tt,H) + (1,H) broadcasts, f32
    h = h * jax.nn.sigmoid(h)                      # SiLU epilogue in f32 (v5e-safe)
    pred = jnp.dot(h.astype(jnp.bfloat16), w2_ref[...], preferred_element_type=jnp.float32)
    pred = pred + b2_ref[...]
    d = pred - target
    partial = jnp.sum(d * d)                       # tile partial of the squared error
    loss_ref[...] = jnp.broadcast_to(partial, loss_ref.shape)   # lane-dense (1,8,128) write


def pallas_decoder_loss(t, x_tok, n_tok, cond3, w1, b1, w2, b2):
    """Fused interp + SiT-stand-in decoder + squared-error partial sums.
    x_tok/n_tok: (B, T, Dp) f32; cond3: (B, 1, H) f32; returns (B*n_tiles, 8, 128) partials."""
    B, T, Dp = x_tok.shape
    Hd = w1.shape[1]
    tt = _choose_row_tile(T, target=128)
    n_tiles = T // tt
    cost = pl.CostEstimate(
        flops=4 * B * T * Dp * Hd,
        transcendentals=B * T * Hd,
        bytes_accessed=(x_tok.size + n_tok.size) * 4 + (w1.size + w2.size) * 2
                       + B * n_tiles * 8 * 128 * 4,
    )
    return pl.pallas_call(
        _decoder_loss_kernel,
        out_shape=jax.ShapeDtypeStruct((B * n_tiles, 8, 128), jnp.float32),
        grid=(B, n_tiles),
        in_specs=[
            pl.BlockSpec(memory_space=pltpu.MemorySpace.SMEM),        # t: (B,) scalars in SMEM
            pl.BlockSpec((1, tt, Dp), lambda b, i: (b, i, 0)),        # image token tile
            pl.BlockSpec((1, tt, Dp), lambda b, i: (b, i, 0)),        # noise token tile
            pl.BlockSpec((1, 1, Hd), lambda b, i: (b, 0, 0)),         # cond row (per batch, no repeat)
            pl.BlockSpec((Dp, Hd), lambda b, i: (0, 0)),              # sit_in_w  (bf16, resident)
            pl.BlockSpec((1, Hd), lambda b, i: (0, 0)),               # sit_in_b
            pl.BlockSpec((Hd, Dp), lambda b, i: (0, 0)),              # sit_out_w (bf16, resident)
            pl.BlockSpec((1, Dp), lambda b, i: (0, 0)),               # sit_out_b
        ],
        out_specs=pl.BlockSpec((1, 8, 128), lambda b, i: (b * n_tiles + i, 0, 0)),
        compiler_params=pltpu.CompilerParams(
            dimension_semantics=("parallel", "parallel"),
            vmem_limit_bytes=_VMEM_LIMIT,
        ),
        cost_estimate=cost,
    )(t, x_tok, n_tok, cond3, w1, b1.reshape(1, Hd), w2, b2.reshape(1, Dp))


# ----------------------------- glue (plain JAX) -----------------------------

def patchify_tokens(x, p):
    """NCHW (B,C,H,W) -> (B, T, C*p*p), batch-major token order."""
    B, C, H, W = x.shape
    x = x.reshape(B, C, H // p, p, W // p, p)
    x = x.transpose(0, 2, 4, 1, 3, 5)             # (B, gh, gw, C, p, p)
    return x.reshape(B, (H // p) * (W // p), C * p * p)


# ----------------------------- model -----------------------------

@dataclass(frozen=True)
class SmallConfig:
    image_size: int = 32          # small stand-in for 256
    codebook_embed_dim: int = 8
    z_channels: int = 64          # small stand-in for 256
    enc_patch_size: int = 16      # = 2^(len(encoder_ch_mult)-1) total downsample of llamagen encoder
    dec_patch_size: int = 16
    sit_hidden: int = 64
    t_freqs: int = 8


def init_params(key, cfg):
    dpatch = 3 * cfg.enc_patch_size ** 2
    ks = jax.random.split(key, 8)

    def w(k, shape, dtype=jnp.float32):
        return (0.02 * jax.random.normal(k, shape, jnp.float32)).astype(dtype)

    return {
        # encoder stand-in (see TODO in _encoder_kernel)
        "enc_w": w(ks[0], (dpatch, cfg.z_channels), jnp.bfloat16),
        "enc_b": jnp.zeros((cfg.z_channels,), jnp.float32),
        # quant_conv = nn.Conv2d(z_channels, codebook_embed_dim, 1)  (per-pixel linear)
        "quant_w": w(ks[1], (cfg.z_channels, cfg.codebook_embed_dim), jnp.bfloat16),
        "quant_b": jnp.zeros((cfg.codebook_embed_dim,), jnp.float32),
        # SiT decoder stand-in
        "sit_in_w": w(ks[2], (dpatch, cfg.sit_hidden), jnp.bfloat16),
        "sit_in_b": jnp.zeros((cfg.sit_hidden,), jnp.float32),
        "t_w": w(ks[3], (2 * cfg.t_freqs, cfg.sit_hidden)),
        "t_b": jnp.zeros((cfg.sit_hidden,), jnp.float32),
        "y_w": w(ks[4], (cfg.codebook_embed_dim, cfg.sit_hidden)),
        "y_b": jnp.zeros((cfg.sit_hidden,), jnp.float32),
        "sit_out_w": w(ks[5], (cfg.sit_hidden, dpatch), jnp.bfloat16),
        "sit_out_b": jnp.zeros((dpatch,), jnp.float32),
    }


def encode(params, cfg, x):
    """AEDiffModel.encode: h = encoder(x); quant = quant_conv(h); diff = 4 zeros; info = None."""
    B, C, H, W = x.shape
    p = cfg.enc_patch_size
    gh, gw = H // p, W // p
    tok = patchify_tokens(x, p).reshape(B * gh * gw, C * p * p).astype(jnp.bfloat16)
    quant_tok = pallas_encode_tokens(tok, params["enc_w"], params["enc_b"],
                                     params["quant_w"], params["quant_b"])   # (B*T, E) f32
    quant = quant_tok.reshape(B, gh, gw, cfg.codebook_embed_dim).transpose(0, 3, 1, 2)  # NCHW
    emb_loss = (jnp.float32(0.0), jnp.float32(0.0), jnp.float32(0.0), jnp.float32(0.0))
    info = None
    return quant, emb_loss, info


def decode_train(params, cfg, quant, x, key):
    """SILoss(prediction='v', path_type='linear', weighting='lognormal'); returns .mean()."""
    B, C, H, W = x.shape
    p = cfg.dec_patch_size
    k1, k2 = jax.random.split(key)
    rnd_normal = jax.random.normal(k1, (B,), jnp.float32)
    sigma = jnp.exp(rnd_normal)
    t = sigma / (1.0 + sigma)                                        # lognormal time, (B,)
    # TODO(synk): reference 'lognormal' weighting only changes the t distribution here; if the
    # upstream SILoss also scales the squared error, add that weight before the mean.
    noise = jax.random.normal(k2, x.shape, jnp.float32)

    x_tok = patchify_tokens(x, p)                                    # (B, T, Dp) f32
    n_tok = patchify_tokens(noise, p)

    # conditioning: sinusoidal timestep features + pooled latent tokens (y = quant), fused MLPs
    freqs = jnp.exp(jnp.arange(cfg.t_freqs, dtype=jnp.float32)
                    * (-jnp.log(10000.0) / cfg.t_freqs))
    targ = t[:, None] * freqs[None, :]                               # (B, F)
    t_feat = jnp.concatenate([jnp.cos(targ), jnp.sin(targ)], axis=-1)
    y_pool = jnp.mean(quant, axis=(2, 3))                            # (B, E)
    cond = pallas_conditioning(t_feat, params["t_w"], params["t_b"],
                               y_pool, params["y_w"], params["y_b"])  # (B, hidden)

    # fused interp + decoder + loss (no cond_tok repeat, no HBM round-trips of model_input/output)
    partials = pallas_decoder_loss(t, x_tok, n_tok, cond[:, None, :],
                                   params["sit_in_w"], params["sit_in_b"],
                                   params["sit_out_w"], params["sit_out_b"])
    total_sq = jnp.sum(partials[:, 0, 0])
    # mean over batch of mean_flat((pred - target)^2)  ==  global sum / (B*C*H*W)
    return total_sq / jnp.float32(B * C * H * W)


def forward(params, cfg, x, key):
    """AEDiffModel.forward(input) -> (dec_loss, diff, info)."""
    quant, diff, info = encode(params, cfg, x)
    dec_loss = decode_train(params, cfg, quant, x, key)
    return dec_loss, diff, info


# ----------------------------- main -----------------------------

if __name__ == "__main__":
    cfg = SmallConfig()
    key = jax.random.PRNGKey(0)
    kx, kp, kn = jax.random.split(key, 3)

    x = jax.random.normal(kx, (2, 3, cfg.image_size, cfg.image_size), jnp.float32)  # NCHW
    params = init_params(kp, cfg)

    fwd = jax.jit(lambda p, xx, kk: forward(p, cfg, xx, kk))
    dec_loss, diff, info = fwd(params, x, kn)
    jax.block_until_ready(dec_loss)
    for d in diff:
        jax.block_until_ready(d)

    assert dec_loss.shape == ()
    assert len(diff) == 4 and all(d.shape == () for d in diff)
    assert info is None
    print("KERNEL_OK")
</pallas_src>

<mosaic_0001>
module attributes {stable_mosaic.version = 11 : i64} {
  func.func @_encoder_kernel(%arg0: i32, %arg1: memref<8x768xbf16, #tpu.memory_space<vmem>>, %arg2: memref<768x64xbf16, #tpu.memory_space<vmem>>, %arg3: memref<1x64xf32, #tpu.memory_space<vmem>>, %arg4: memref<64x8xbf16, #tpu.memory_space<vmem>>, %arg5: memref<1x8xf32, #tpu.memory_space<vmem>>, %arg6: memref<8x8xf32, #tpu.memory_space<vmem>>) attributes {dimension_semantics = [#tpu.dimension_semantics<parallel>], iteration_bounds = array<i64: 1>, scalar_prefetch = 0 : i64, scratch_operands = 0 : i64, tpu.core_type = #tpu.core_type<tc>, window_params = [{transform_indices = @transform_0, window_bounds = array<i64: 8, 768>}, {pipeline_mode = #tpu.pipeline_mode<synchronous>, transform_indices = @transform_1, window_bounds = array<i64: 768, 64>}, {pipeline_mode = #tpu.pipeline_mode<synchronous>, transform_indices = @transform_2, window_bounds = array<i64: 1, 64>}, {pipeline_mode = #tpu.pipeline_mode<synchronous>, transform_indices = @transform_3, window_bounds = array<i64: 64, 8>}, {pipeline_mode = #tpu.pipeline_mode<synchronous>, transform_indices = @transform_4, window_bounds = array<i64: 1, 8>}, {transform_indices = @transform_5, window_bounds = array<i64: 8, 8>}]} {
    %c0 = arith.constant 0 : index
    %c0_0 = arith.constant 0 : index
    %0 = vector.load %arg1[%c0, %c0_0] : memref<8x768xbf16, #tpu.memory_space<vmem>>, vector<8x768xbf16>
    %c0_1 = arith.constant 0 : index
    %c0_2 = arith.constant 0 : index
    %1 = vector.load %arg2[%c0_1, %c0_2] : memref<768x64xbf16, #tpu.memory_space<vmem>>, vector<768x64xbf16>
    %cst = arith.constant dense<0.000000e+00> : vector<8x64xf32>
    %2 = tpu.matmul %0, %1, %cst {dimension_numbers = #tpu.dot_dimension_numbers<[1], [0], [0], [1], [0, 0, 1, 1], [], []>} : vector<8x768xbf16>, vector<768x64xbf16>, vector<8x64xf32> -> vector<8x64xf32>
    %c0_3 = arith.constant 0 : index
    %c0_4 = arith.constant 0 : index
    %3 = vector.load %arg3[%c0_3, %c0_4] : memref<1x64xf32, #tpu.memory_space<vmem>>, vector<1x64xf32>
    %4 = vector.broadcast %3 : vector<1x64xf32> to vector<8x64xf32>
    %5 = arith.addf %2, %4 : vector<8x64xf32>
    %6 = arith.truncf %5 : vector<8x64xf32> to vector<8x64xbf16>
    %c0_5 = arith.constant 0 : index
    %c0_6 = arith.constant 0 : index
    %7 = vector.load %arg4[%c0_5, %c0_6] : memref<64x8xbf16, #tpu.memory_space<vmem>>, vector<64x8xbf16>
    %cst_7 = arith.constant dense<0.000000e+00> : vector<8x8xf32>
    %8 = tpu.matmul %6, %7, %cst_7 {dimension_numbers = #tpu.dot_dimension_numbers<[1], [0], [0], [1], [0, 0, 1, 1], [], []>} : vector<8x64xbf16>, vector<64x8xbf16>, vector<8x8xf32> -> vector<8x8xf32>
    %c0_8 = arith.constant 0 : index
    %c0_9 = arith.constant 0 : index
    %9 = vector.load %arg5[%c0_8, %c0_9] : memref<1x8xf32, #tpu.memory_space<vmem>>, vector<1x8xf32>
    %10 = vector.broadcast %9 : vector<1x8xf32> to vector<8x8xf32>
    %11 = arith.addf %8, %10 : vector<8x8xf32>
    %c0_10 = arith.constant 0 : index
    %c0_11 = arith.constant 0 : index
    %12 = vector.load %arg6[%c0_10, %c0_11] : memref<8x8xf32, #tpu.memory_space<vmem>>, vector<8x8xf32>
    tpu.vector_store %arg6[%c0_10, %c0_11], %11 {strides = array<i32>} : memref<8x8xf32, #tpu.memory_space<vmem>>, vector<8x8xf32>,
    return
  }
  func.func @transform_0(%arg0: i32) -> (i32, i32) {
    %c0_i32 = arith.constant 0 : i32
    %c0_i32_0 = arith.constant 0 : i32
    return %arg0, %c0_i32 : i32, i32
  }
  func.func @transform_1(%arg0: i32) -> (i32, i32) {
    %c0_i32 = arith.constant 0 : i32
    %c0_i32_0 = arith.constant 0 : i32
    %c0_i32_1 = arith.constant 0 : i32
    return %c0_i32, %c0_i32_0 : i32, i32
  }
  func.func @transform_2(%arg0: i32) -> (i32, i32) {
    %c0_i32 = arith.constant 0 : i32
    %c0_i32_0 = arith.constant 0 : i32
    %c0_i32_1 = arith.constant 0 : i32
    return %c0_i32, %c0_i32_0 : i32, i32
  }
  func.func @transform_3(%arg0: i32) -> (i32, i32) {
    %c0_i32 = arith.constant 0 : i32
    %c0_i32_0 = arith.constant 0 : i32
    %c0_i32_1 = arith.constant 0 : i32
    return %c0_i32, %c0_i32_0 : i32, i32
  }
  func.func @transform_4(%arg0: i32) -> (i32, i32) {
    %c0_i32 = arith.constant 0 : i32
    %c0_i32_0 = arith.constant 0 : i32
    %c0_i32_1 = arith.constant 0 : i32
    return %c0_i32, %c0_i32_0 : i32, i32
  }
  func.func @transform_5(%arg0: i32) -> (i32, i32) {
    %c0_i32 = arith.constant 0 : i32
    %c0_i32_0 = arith.constant 0 : i32
    return %arg0, %c0_i32 : i32, i32
  }
}

module attributes {stable_mosaic.version = 11 : i64} {
  func.func @_cond_kernel(%arg0: i32, %arg1: memref<2x16xf32, #tpu.memory_space<vmem>>, %arg2: memref<16x64xf32, #tpu.memory_space<vmem>>, %arg3: memref<1x64xf32, #tpu.memory_space<vmem>>, %arg4: memref<2x8xf32, #tpu.memory_space<vmem>>, %arg5: memref<8x64xf32, #tpu.memory_space<vmem>>, %arg6: memref<1x64xf32, #tpu.memory_space<vmem>>, %arg7: memref<2x64xf32, #tpu.memory_space<vmem>>) attributes {dimension_semantics = [#tpu.dimension_semantics<arbitrary>], iteration_bounds = array<i64: 1>, scalar_prefetch = 0 : i64, scratch_operands = 0 : i64, tpu.core_type = #tpu.core_type<tc>, window_params = [{pipeline_mode = #tpu.pipeline_mode<synchronous>, transform_indices = @transform_0, window_bounds = array<i64: 2, 16>}, {pipeline_mode = #tpu.pipeline_mode<synchronous>, transform_indices = @transform_1, window_bounds = array<i64: 16, 64>}, {pipeline_mode = #tpu.pipeline_mode<synchronous>, transform_indices = @transform_2, window_bounds = array<i64: 1, 64>}, {pipeline_mode = #tpu.pipeline_mode<synchronous>, transform_indices = @transform_3, window_bounds = array<i64: 2, 8>}, {pipeline_mode = #tpu.pipeline_mode<synchronous>, transform_indices = @transform_4, window_bounds = array<i64: 8, 64>}, {pipeline_mode = #tpu.pipeline_mode<synchronous>, transform_indices = @transform_5, window_bounds = array<i64: 1, 64>}, {pipeline_mode = #tpu.pipeline_mode<synchronous>, transform_indices = @transform_6, window_bounds = array<i64: 2, 64>}]} {
    %c0 = arith.constant 0 : index
    %c0_0 = arith.constant 0 : index
    %0 = vector.load %arg1[%c0, %c0_0] : memref<2x16xf32, #tpu.memory_space<vmem>>, vector<2x16xf32>
    %c0_1 = arith.constant 0 : index
    %c0_2 = arith.constant 0 : index
    %1 = vector.load %arg2[%c0_1, %c0_2] : memref<16x64xf32, #tpu.memory_space<vmem>>, vector<16x64xf32>
    %cst = arith.constant dense<0.000000e+00> : vector<2x64xf32>
    %2 = tpu.matmul %0, %1, %cst {dimension_numbers = #tpu.dot_dimension_numbers<[1], [0], [0], [1], [0, 0, 1, 1], [], []>} : vector<2x16xf32>, vector<16x64xf32>, vector<2x64xf32> -> vector<2x64xf32>
    %c0_3 = arith.constant 0 : index
    %c0_4 = arith.constant 0 : index
    %3 = vector.load %arg3[%c0_3, %c0_4] : memref<1x64xf32, #tpu.memory_space<vmem>>, vector<1x64xf32>
    %4 = vector.broadcast %3 : vector<1x64xf32> to vector<2x64xf32>
    %5 = arith.addf %2, %4 : vector<2x64xf32>
    %6 = arith.negf %5 : vector<2x64xf32>
    %7 = math.exp %6 : vector<2x64xf32>
    %cst_5 = arith.constant 1.000000e+00 : f32
    %8 = vector.broadcast %cst_5 : f32 to vector<2x64xf32>
    %9 = arith.addf %8, %7 : vector<2x64xf32>
    %10 = arith.divf %8, %9 : vector<2x64xf32>
    %11 = arith.mulf %5, %10 : vector<2x64xf32>
    %c0_6 = arith.constant 0 : index
    %c0_7 = arith.constant 0 : index
    %12 = vector.load %arg4[%c0_6, %c0_7] : memref<2x8xf32, #tpu.memory_space<vmem>>, vector<2x8xf32>
    %c0_8 = arith.constant 0 : index
    %c0_9 = arith.constant 0 : index
    %13 = vector.load %arg5[%c0_8, %c0_9] : memref<8x64xf32, #tpu.memory_space<vmem>>, vector<8x64xf32>
    %cst_10 = arith.constant dense<0.000000e+00> : vector<2x64xf32>
    %14 = tpu.matmul %12, %13, %cst_10 {dimension_numbers = #tpu.dot_dimension_numbers<[1], [0], [0], [1], [0, 0, 1, 1], [], []>} : vector<2x8xf32>, vector<8x64xf32>, vector<2x64xf32> -> vector<2x64xf32>
    %c0_11 = arith.constant 0 : index
    %c0_12 = arith.constant 0 : index
    %15 = vector.load %arg6[%c0_11, %c0_12] : memref<1x64xf32, #tpu.memory_space<vmem>>, vector<1x64xf32>
    %16 = vector.broadcast %15 : vector<1x64xf32> to vector<2x64xf32>
    %17 = arith.addf %14, %16 : vector<2x64xf32>
    %18 = arith.negf %17 : vector<2x64xf32>
    %19 = math.exp %18 : vector<2x64xf32>
    %cst_13 = arith.constant 1.000000e+00 : f32
    %20 = vector.broadcast %cst_13 : f32 to vector<2x64xf32>
    %21 = arith.addf %20, %19 : vector<2x64xf32>
    %22 = arith.divf %20, %21 : vector<2x64xf32>
    %23 = arith.mulf %17, %22 : vector<2x64xf32>
    %24 = arith.addf %11, %23 : vector<2x64xf32>
    %c0_14 = arith.constant 0 : index
    %c0_15 = arith.constant 0 : index
    %25 = vector.load %arg7[%c0_14, %c0_15] : memref<2x64xf32, #tpu.memory_space<vmem>>, vector<2x64xf32>
    tpu.vector_store %arg7[%c0_14, %c0_15], %24 {strides = array<i32>} : memref<2x64xf32, #tpu.memory_space<vmem>>, vector<2x64xf32>,
    return
  }
  func.func @transform_0(%arg0: i32) -> (i32, i32) {
    %c0_i32 = arith.constant 0 : i32
    %c0_i32_0 = arith.constant 0 : i32
    %c0_i32_1 = arith.constant 0 : i32
    return %c0_i32, %c0_i32_0 : i32, i32
  }
  func.func @transform_1(%arg0: i32) -> (i32, i32) {
    %c0_i32 = arith.constant 0 : i32
    %c0_i32_0 = arith.constant 0 : i32
    %c0_i32_1 = arith.constant 0 : i32
    return %c0_i32, %c0_i32_0 : i32, i32
  }
  func.func @transform_2(%arg0: i32) -> (i32, i32) {
    %c0_i32 = arith.constant 0 : i32
    %c0_i32_0 = arith.constant 0 : i32
    %c0_i32_1 = arith.constant 0 : i32
    return %c0_i32, %c0_i32_0 : i32, i32
  }
  func.func @transform_3(%arg0: i32) -> (i32, i32) {
    %c0_i32 = arith.constant 0 : i32
    %c0_i32_0 = arith.constant 0 : i32
    %c0_i32_1 = arith.constant 0 : i32
    return %c0_i32, %c0_i32_0 : i32, i32
  }
  func.func @transform_4(%arg0: i32) -> (i32, i32) {
    %c0_i32 = arith.constant 0 : i32
    %c0_i32_0 = arith.constant 0 : i32
    %c0_i32_1 = arith.constant 0 : i32
    return %c0_i32, %c0_i32_0 : i32, i32
  }
  func.func @transform_5(%arg0: i32) -> (i32, i32) {
    %c0_i32 = arith.constant 0 : i32
    %c0_i32_0 = arith.constant 0 : i32
    %c0_i32_1 = arith.constant 0 : i32
    return %c0_i32, %c0_i32_0 : i32, i32
  }
  func.func @transform_6(%arg0: i32) -> (i32, i32) {
    %c0_i32 = arith.constant 0 : i32
    %c0_i32_0 = arith.constant 0 : i32
    %c0_i32_1 = arith.constant 0 : i32
    return %c0_i32, %c0_i32_0 : i32, i32
  }
}

module attributes {stable_mosaic.version = 11 : i64} {
  func.func @_decoder_loss_kernel(%arg0: i32, %arg1: i32, %arg2: memref<2xf32, #tpu.memory_space<smem>>, %arg3: memref<1x4x768xf32, #tpu.memory_space<vmem>>, %arg4: memref<1x4x768xf32, #tpu.memory_space<vmem>>, %arg5: memref<1x1x64xf32, #tpu.memory_space<vmem>>, %arg6: memref<768x64xbf16, #tpu.memory_space<vmem>>, %arg7: memref<1x64xf32, #tpu.memory_space<vmem>>, %arg8: memref<64x768xbf16, #tpu.memory_space<vmem>>, %arg9: memref<1x768xf32, #tpu.memory_space<vmem>>, %arg10: memref<1x8x128xf32, #tpu.memory_space<vmem>>) attributes {dimension_semantics = [#tpu.dimension_semantics<parallel>, #tpu.dimension_semantics<parallel>], iteration_bounds = array<i64: 2, 1>, scalar_prefetch = 0 : i64, scratch_operands = 0 : i64, tpu.core_type = #tpu.core_type<tc>, window_params = [{transform_indices = @transform_0, window_bounds = array<i64: 2>}, {transform_indices = @transform_1, window_bounds = array<i64: 1, 4, 768>}, {transform_indices = @transform_2, window_bounds = array<i64: 1, 4, 768>}, {transform_indices = @transform_3, window_bounds = array<i64: 1, 1, 64>}, {pipeline_mode = #tpu.pipeline_mode<synchronous>, transform_indices = @transform_4, window_bounds = array<i64: 768, 64>}, {pipeline_mode = #tpu.pipeline_mode<synchronous>, transform_indices = @transform_5, window_bounds = array<i64: 1, 64>}, {pipeline_mode = #tpu.pipeline_mode<synchronous>, transform_indices = @transform_6, window_bounds = array<i64: 64, 768>}, {pipeline_mode = #tpu.pipeline_mode<synchronous>, transform_indices = @transform_7, window_bounds = array<i64: 1, 768>}, {transform_indices = @transform_8, window_bounds = array<i64: 1, 8, 128>}]} {
    %0 = arith.index_cast %arg0 : i32 to index
    %1 = memref.load %arg2[%0] : memref<2xf32, #tpu.memory_space<smem>>
    %c0 = arith.constant 0 : index
    %c0_0 = arith.constant 0 : index
    %c0_1 = arith.constant 0 : index
    %2 = vector.load %arg3[%c0, %c0_0, %c0_1] : memref<1x4x768xf32, #tpu.memory_space<vmem>>, vector<1x4x768xf32>
    %3 = vector.shape_cast %2 : vector<1x4x768xf32> to vector<4x768xf32>
    %c0_2 = arith.constant 0 : index
    %c0_3 = arith.constant 0 : index
    %c0_4 = arith.constant 0 : index
    %4 = vector.load %arg4[%c0_2, %c0_3, %c0_4] : memref<1x4x768xf32, #tpu.memory_space<vmem>>, vector<1x4x768xf32>
    %5 = vector.shape_cast %4 : vector<1x4x768xf32> to vector<4x768xf32>
    %cst = arith.constant 1.000000e+00 : f32
    %6 = arith.subf %cst, %1 : f32
    %7 = vector.broadcast %6 : f32 to vector<4x768xf32>
    %8 = arith.mulf %7, %3 : vector<4x768xf32>
    %9 = vector.broadcast %1 : f32 to vector<4x768xf32>
    %10 = arith.mulf %9, %5 : vector<4x768xf32>
    %11 = arith.addf %8, %10 : vector<4x768xf32>
    %12 = arith.subf %5, %3 : vector<4x768xf32>
    %13 = arith.truncf %11 : vector<4x768xf32> to vector<4x768xbf16>
    %c0_5 = arith.constant 0 : index
    %c0_6 = arith.constant 0 : index
    %14 = vector.load %arg6[%c0_5, %c0_6] : memref<768x64xbf16, #tpu.memory_space<vmem>>, vector<768x64xbf16>
    %cst_7 = arith.constant dense<0.000000e+00> : vector<4x64xf32>
    %15 = tpu.matmul %13, %14, %cst_7 {dimension_numbers = #tpu.dot_dimension_numbers<[1], [0], [0], [1], [0, 0, 1, 1], [], []>} : vector<4x768xbf16>, vector<768x64xbf16>, vector<4x64xf32> -> vector<4x64xf32>
    %c0_8 = arith.constant 0 : index
    %c0_9 = arith.constant 0 : index
    %16 = vector.load %arg7[%c0_8, %c0_9] : memref<1x64xf32, #tpu.memory_space<vmem>>, vector<1x64xf32>
    %17 = vector.broadcast %16 : vector<1x64xf32> to vector<4x64xf32>
    %18 = arith.addf %15, %17 : vector<4x64xf32>
    %c0_10 = arith.constant 0 : index
    %c0_11 = arith.constant 0 : index
    %c0_12 = arith.constant 0 : index
    %19 = vector.load %arg5[%c0_10, %c0_11, %c0_12] : memref<1x1x64xf32, #tpu.memory_space<vmem>>, vector<1x1x64xf32>
    %20 = vector.shape_cast %19 : vector<1x1x64xf32> to vector<1x64xf32>
    %21 = vector.broadcast %20 : vector<1x64xf32> to vector<4x64xf32>
    %22 = arith.addf %18, %21 : vector<4x64xf32>
    %23 = arith.negf %22 : vector<4x64xf32>
    %24 = math.exp %23 : vector<4x64xf32>
    %cst_13 = arith.constant 1.000000e+00 : f32
    %25 = vector.broadcast %cst_13 : f32 to vector<4x64xf32>
    %26 = arith.addf %25, %24 : vector<4x64xf32>
    %27 = arith.divf %25, %26 : vector<4x64xf32>
    %28 = arith.mulf %22, %27 : vector<4x64xf32>
    %29 = arith.truncf %28 : vector<4x64xf32> to vector<4x64xbf16>
    %c0_14 = arith.constant 0 : index
    %c0_15 = arith.constant 0 : index
    %30 = vector.load %arg8[%c0_14, %c0_15] : memref<64x768xbf16, #tpu.memory_space<vmem>>, vector<64x768xbf16>
    %cst_16 = arith.constant dense<0.000000e+00> : vector<4x768xf32>
    %31 = tpu.matmul %29, %30, %cst_16 {dimension_numbers = #tpu.dot_dimension_numbers<[1], [0], [0], [1], [0, 0, 1, 1], [], []>} : vector<4x64xbf16>, vector<64x768xbf16>, vector<4x768xf32> -> vector<4x768xf32>
    %c0_17 = arith.constant 0 : index
    %c0_18 = arith.constant 0 : index
    %32 = vector.load %arg9[%c0_17, %c0_18] : memref<1x768xf32, #tpu.memory_space<vmem>>, vector<1x768xf32>
    %33 = vector.broadcast %32 : vector<1x768xf32> to vector<4x768xf32>
    %34 = arith.addf %31, %33 : vector<4x768xf32>
    %35 = arith.subf %34, %12 : vector<4x768xf32>
    %36 = arith.mulf %35, %35 : vector<4x768xf32>
    %37 = vector.shape_cast %36 : vector<4x768xf32> to vector<1x4x768xf32>
    %cst_19 = arith.constant dense<0.000000e+00> : vector<1xf32>
    %38 = vector.multi_reduction <add>, %37, %cst_19 [1, 2] : vector<1x4x768xf32> to vector<1xf32>
    %39 = vector.shape_cast %38 : vector<1xf32> to vector<1x1x1xf32>
    %40 = vector.extract %39[0, 0, 0] : f32 from vector<1x1x1xf32>
    %41 = vector.broadcast %40 : f32 to vector<1x8x128xf32>
    %c0_20 = arith.constant 0 : index
    %c0_21 = arith.constant 0 : index
    %c0_22 = arith.constant 0 : index
    %42 = vector.load %arg10[%c0_20, %c0_21, %c0_22] : memref<1x8x128xf32, #tpu.memory_space<vmem>>, vector<1x8x128xf32>
    tpu.vector_store %arg10[%c0_20, %c0_21, %c0_22], %41 {strides = array<i32>} : memref<1x8x128xf32, #tpu.memory_space<vmem>>, vector<1x8x128xf32>,
    return
  }
  func.func @transform_0(%arg0: i32, %arg1: i32) -> i32 {
    %c0_i32 = arith.constant 0 : i32
    %c0_i32_0 = arith.constant 0 : i32
    return %c0_i32 : i32
  }
  func.func @transform_1(%arg0: i32, %arg1: i32) -> (i32, i32, i32) {
    %c0_i32 = arith.constant 0 : i32
    %c0_i32_0 = arith.constant 0 : i32
    return %arg0, %arg1, %c0_i32 : i32, i32, i32
  }
  func.func @transform_2(%arg0: i32, %arg1: i32) -> (i32, i32, i32) {
    %c0_i32 = arith.constant 0 : i32
    %c0_i32_0 = arith.constant 0 : i32
    return %arg0, %arg1, %c0_i32 : i32, i32, i32
  }
  func.func @transform_3(%arg0: i32, %arg1: i32) -> (i32, i32, i32) {
    %c0_i32 = arith.constant 0 : i32
    %c0_i32_0 = arith.constant 0 : i32
    %c0_i32_1 = arith.constant 0 : i32
    return %arg0, %c0_i32, %c0_i32_0 : i32, i32, i32
  }
  func.func @transform_4(%arg0: i32, %arg1: i32) -> (i32, i32) {
    %c0_i32 = arith.constant 0 : i32
    %c0_i32_0 = arith.constant 0 : i32
    %c0_i32_1 = arith.constant 0 : i32
    return %c0_i32, %c0_i32_0 : i32, i32
  }
  func.func @transform_5(%arg0: i32, %arg1: i32) -> (i32, i32) {
    %c0_i32 = arith.constant 0 : i32
    %c0_i32_0 = arith.constant 0 : i32
    %c0_i32_1 = arith.constant 0 : i32
    return %c0_i32, %c0_i32_0 : i32, i32
  }
  func.func @transform_6(%arg0: i32, %arg1: i32) -> (i32, i32) {
    %c0_i32 = arith.constant 0 : i32
    %c0_i32_0 = arith.constant 0 : i32
    %c0_i32_1 = arith.constant 0 : i32
    return %c0_i32, %c0_i32_0 : i32, i32
  }
  func.func @transform_7(%arg0: i32, %arg1: i32) -> (i32, i32) {
    %c0_i32 = arith.constant 0 : i32
    %c0_i32_0 = arith.constant 0 : i32
    %c0_i32_1 = arith.constant 0 : i32
    return %c0_i32, %c0_i32_0 : i32, i32
  }
  func.func @transform_8(%arg0: i32, %arg1: i32) -> (i32, i32, i32) {
    %c1_i32 = arith.constant 1 : i32
    %0 = arith.muli %arg0, %c1_i32 : i32
    %1 = arith.addi %0, %arg1 : i32
    %c0_i32 = arith.constant 0 : i32
    %c0_i32_0 = arith.constant 0 : i32
    %c0_i32_1 = arith.constant 0 : i32
    return %1, %c0_i32, %c0_i32_0 : i32, i32, i32
  }
}

</mosaic_0001>

<bundles_post_ra>
// kernel: _lambda_.3
= control target key start
LH: loop header
LB: loop body
LE: loop exit
PB: predicated region body
PF: predicated region fallthrough
CT: control target
= control target key end

     0   :  { %v850_v57 = vmov 0.0   ;;  %vm851_vm0 = vmmov 0   ;;  %vm596_vm1 = vcmask 523264   ;;  %vm640_vm2 = vcmask 64512   ;;  %s1056_s1 = inlined_call_operand.vmem [shape: bf16[768,64], index: 1, kind: input, shape index: {}]   ;;  %s1057_s0 = inlined_call_operand.vmem [shape: bf16[8,768], index: 0, kind: input, shape index: {}]   ;;  %s1058_s3 = inlined_call_operand.vmem [shape: bf16[64,8], index: 3, kind: input, shape index: {}]   ;;  %s1059_s2 = inlined_call_operand.vmem [shape: f32[1,64], index: 2, kind: input, shape index: {}]   ;;  %s1060_s4 = inlined_call_operand.vmem [shape: f32[1,8], index: 4, kind: input, shape index: {}]   ;;  %s1061_s5 = inlined_call_operand.vmem [shape: f32[8,8], index: 5, kind: output, shape index: {}]  }
   0x1   :  { %v792_v0 = vld [vmem:[%s1056_s1 + $0x40] sm:$0xff]   ;;  %v796_v4 = vld [vmem:[%s1056_s1 + $0x48] sm:$0xff]   ;;  %v800_v8 = vld [vmem:[%s1056_s1 + $0x50] sm:$0xff]  }
   0x2   :  { %v793_v1 = vld [vmem:[%s1056_s1] sm:$0xff]   ;;  %707 = vmatprep.subr.bf16.mxu0 %v792_v0  ;;  %v797_v5 = vld [vmem:[%s1056_s1 + $0x8] sm:$0xff]   ;;  %v801_v9 = vld [vmem:[%s1056_s1 + $0x10] sm:$0xff]  }
   0x3   :  { %v794_v2 = vld [vmem:[%s1056_s1 + $0xc0] sm:$0xff]   ;;  %708 = vmatpush3.bf16.msra.mxu0 %v793_v1  ;;  %v798_v6 = vld [vmem:[%s1056_s1 + $0xc8] sm:$0xff]   ;;  %v802_v10 = vld [vmem:[%s1056_s1 + $0xd0] sm:$0xff]  }
   0x4   :  { %v795_v3 = vld [vmem:[%s1056_s1 + $0x80] sm:$0xff]   ;;  %729 = vmatprep.subr.bf16.mxu1 %v794_v2  ;;  %709 = vmatprep.subr.bf16.mxu0 %v796_v4  ;;  %v799_v7 = vld [vmem:[%s1056_s1 + $0x88] sm:$0xff]   ;;  %v803_v11 = vld [vmem:[%s1056_s1 + $0x90] sm:$0xff]  }
   0x5   :  { %730 = vmatpush3.bf16.msra.mxu1 %v795_v3  ;;  %v804_v12 = vld [vmem:[%s1056_s1 + $0x58] sm:$0xff]   ;;  %v808_v16 = vld [vmem:[%s1056_s1 + $0x60] sm:$0xff]   ;;  %v812_v20 = vld [vmem:[%s1056_s1 + $0x68] sm:$0xff]  }
   0x6   :  { %731 = vmatprep.subr.bf16.mxu1 %v798_v6  ;;  %v805_v13 = vld [vmem:[%s1056_s1 + $0x18] sm:$0xff]   ;;  %v809_v17 = vld [vmem:[%s1056_s1 + $0x20] sm:$0xff]   ;;  %v813_v21 = vld [vmem:[%s1056_s1 + $0x28] sm:$0xff]  }
   0x7   :  { %710 = vmatpush3.bf16.msra.mxu0 %v797_v5  ;;  %v806_v14 = vld [vmem:[%s1056_s1 + $0xd8] sm:$0xff]   ;;  %v810_v18 = vld [vmem:[%s1056_s1 + $0xe0] sm:$0xff]   ;;  %v814_v22 = vld [vmem:[%s1056_s1 + $0xe8] sm:$0xff]  }
   0x8   :  { %711 = vmatprep.subr.bf16.mxu0 %v800_v8  ;;  %v807_v15 = vld [vmem:[%s1056_s1 + $0x98] sm:$0xff]   ;;  %v811_v19 = vld [vmem:[%s1056_s1 + $0xa0] sm:$0xff]   ;;  %v815_v23 = vld [vmem:[%s1056_s1 + $0xa8] sm:$0xff]  }
   0x9   :  { %732 = vmatpush3.bf16.msra.mxu1 %v799_v7  ;;  %v816_v24 = vld [vmem:[%s1056_s1 + $0x70] sm:$0xff]   ;;  %v820_v28 = vld [vmem:[%s1056_s1 + $0x78] sm:$0xff]   ;;  %v21_v31 = vld [vmem:[%s1057_s0] sm:$0xff] }
   0xa   :  { %733 = vmatprep.subr.bf16.mxu1 %v802_v10  ;;  %v817_v25 = vld [vmem:[%s1056_s1 + $0x30] sm:$0xff]   ;;  %v821_v29 = vld [vmem:[%s1056_s1 + $0x38] sm:$0xff]   ;;  %v647_v32 = vcombine.low %v21_v31, %v21_v31  ;;  %v648_v33 = vcombine.high %v21_v31, %v21_v31  ;;  %v826_v35 = vld [vmem:[%s1056_s1 + $0x140] sm:$0xff]  }
   0xb   :  { %712 = vmatpush3.bf16.msra.mxu0 %v801_v9  ;;  %v818_v26 = vld [vmem:[%s1056_s1 + $0xf0] sm:$0xff]   ;;  %v822_v30 = vld [vmem:[%s1056_s1 + $0xf8] sm:$0xff]   ;;  %v22_v36 = vld [vmem:[%s1057_s0 + $0x8] sm:$0xff] }
   0xc   :  { %713 = vmatprep.subr.bf16.mxu0 %v804_v12  ;;  %v819_v27 = vld [vmem:[%s1056_s1 + $0xb0] sm:$0xff]   ;;  %v825_v34 = vld [vmem:[%s1056_s1 + $0xb8] sm:$0xff]   ;;  %468 = vmatprep.mubr.bf16.mxu0 %v648_v33  ;;  %v649_v37 = vcombine.low %v22_v36, %v22_v36  ;;  %v650_v38 = vcombine.high %v22_v36, %v22_v36  ;;  %v829_v39 = vld [vmem:[%s1056_s1 + $0x100] sm:$0xff]  }
   0xd   :  { %734 = vmatpush3.bf16.msra.mxu1 %v803_v11  ;;  %v830_v40 = vld [vmem:[%s1056_s1 + $0x148] sm:$0xff]   ;;  %v832_v42 = vld [vmem:[%s1056_s1 + $0x150] sm:$0xff]   ;;  %v834_v44 = vld [vmem:[%s1056_s1 + $0x158] sm:$0xff]  }
   0xe   :  { %735 = vmatprep.subr.bf16.mxu1 %v806_v14  ;;  %508 = vmatprep.mubr.bf16.mxu1 %v650_v38  ;;  %v831_v41 = vld [vmem:[%s1056_s1 + $0x108] sm:$0xff]   ;;  %v833_v43 = vld [vmem:[%s1056_s1 + $0x110] sm:$0xff]   ;;  %v835_v45 = vld [vmem:[%s1056_s1 + $0x118] sm:$0xff]  }
   0xf   :  { %714 = vmatpush3.bf16.msra.mxu0 %v805_v13  ;;  %v836_v46 = vld [vmem:[%s1056_s1 + $0x160] sm:$0xff]   ;;  %v23_v48 = vld [vmem:[%s1057_s0 + $0x10] sm:$0xff]  ;;  %v838_v49 = vld [vmem:[%s1056_s1 + $0x168] sm:$0xff]  }
  0x10   :  { %715 = vmatprep.subr.bf16.mxu0 %v808_v16  ;;  %v837_v47 = vld [vmem:[%s1056_s1 + $0x120] sm:$0xff]   ;;  %v652_v50 = vcombine.high %v23_v48, %v23_v48  ;;  %v839_v51 = vld [vmem:[%s1056_s1 + $0x128] sm:$0xff]   ;;  %v840_v52 = vld [vmem:[%s1056_s1 + $0x170] sm:$0xff]   ;;  %v651_v56 = vcombine.low %v23_v48, %v23_v48 }
  0x11   :  { %736 = vmatpush3.bf16.msra.mxu1 %v807_v15  ;;  %v841_v53 = vld [vmem:[%s1056_s1 + $0x130] sm:$0xff]   ;;  %v842_v54 = vld [vmem:[%s1056_s1 + $0x178] sm:$0xff]   ;;  %v846_v58 = vld [vmem:[%s1058_s3] sm:$0xff]  }
  0x12   :  { %737 = vmatprep.subr.bf16.mxu1 %v810_v18  ;;  %v843_v55 = vld [vmem:[%s1056_s1 + $0x138] sm:$0xff]   ;;  %v847_v59 = vld [vmem:[%s1058_s3 + $0x8] sm:$0xff]   ;;  %v848_v60 = vld [vmem:[%s1058_s3 + $0x10] sm:$0xff]  }
  0x13   :  { %716 = vmatpush3.bf16.msra.mxu0 %v809_v17  ;;  %v849_v61 = vld [vmem:[%s1058_s3 + $0x18] sm:$0xff]   ;;  %v646_v63 = vld [vmem:[%s1059_s2] ss:$0 sm:$0xff] }
  0x14   :  { %717 = vmatprep.subr.bf16.mxu0 %v812_v20  ;;  %v701_v18 = vld [vmem:[%s1060_s4] ss:$0 sm:$0xff] }
  0x15   :  { %738 = vmatpush3.bf16.msra.mxu1 %v811_v19 }
  0x16   :  { %739 = vmatprep.subr.bf16.mxu1 %v814_v22 }
  0x17   :  { %718 = vmatpush3.bf16.msra.mxu0 %v813_v21 }
  0x18   :  { %719 = vmatprep.subr.bf16.mxu0 %v816_v24 }
  0x19   :  { %740 = vmatpush3.bf16.msra.mxu1 %v815_v23 }
  0x1a   :  { %741 = vmatprep.subr.bf16.mxu1 %v818_v26 }
  0x1b   :  { %720 = vmatpush3.bf16.msra.mxu0 %v817_v25 }
  0x1c   :  { %721 = vmatprep.subr.bf16.mxu0 %v820_v28 }
  0x1d   :  { %742 = vmatpush3.bf16.msra.mxu1 %v819_v27 }
  0x1e   :  { %743 = vmatprep.subr.bf16.mxu1 %v822_v30 }
  0x1f   :  { %722 = vmatpush3.bf16.msra.mxu0 %v821_v29 }
  0x20   :  { %751 = vmatprep.subr.bf16.mxu0 %v826_v35 }
  0x21   :  { %744 = vmatpush3.bf16.msra.mxu1 %v825_v34 }
  0x22   :  { %469 = vmatmul.mubr.bf16.vlgmr.msra.gmra.mrb[0].mxu0 %v647_v32  ;;  %778 = vmatprep.subr.bf16.mxu1 %v850_v57 }
  0x23   :  { %752 = vmatpush3.bf16.msra.mxu0 %v829_v39  ;;  %548 = vmatprep.mubr.bf16.mxu0 %v652_v50 }
  0x24   :  { %509 = vmatmul.mubr.bf16.vlgmr.msra.gmra.mrb[0].mxu1 %v649_v37  ;;  %753 = vmatprep.subr.bf16.mxu0 %v830_v40 }
  0x25   :  { %779 = vmatpush3.bf16.msra.mxu1 %v846_v58  ;;  %786 = vmatprep.mubr.msk.bf16.mxu1 %vm851_vm0, %v850_v57 }
  0x26   :  { %780 = vmatprep.subr.bf16.mxu1 %v850_v57 }
  0x27   :  { %754 = vmatpush3.bf16.msra.mxu0 %v831_v41 }
  0x28   :  { %755 = vmatprep.subr.bf16.mxu0 %v832_v42 }
  0x29   :  { %781 = vmatpush3.bf16.msra.mxu1 %v847_v59 }
  0x2a   :  { %782 = vmatprep.subr.bf16.mxu1 %v850_v57 }
  0x2b   :  { %756 = vmatpush3.bf16.msra.mxu0 %v833_v43 }
  0x2c   :  { %757 = vmatprep.subr.bf16.mxu0 %v834_v44 }
  0x2d   :  { %783 = vmatpush3.bf16.msra.mxu1 %v848_v60 }
  0x2e   :  { %784 = vmatprep.subr.bf16.mxu1 %v850_v57 }
  0x2f   :  { %758 = vmatpush3.bf16.msra.mxu0 %v835_v45 }
  0x30   :  { %759 = vmatprep.subr.bf16.mxu0 %v836_v46 }
  0x31   :  { %785 = vmatpush3.bf16.msra.mxu1 %v849_v61 }
  0x33   :  { %760 = vmatpush3.bf16.msra.mxu0 %v837_v47 }
  0x34   :  { %761 = vmatprep.subr.bf16.mxu0 %v838_v49 }
  0x37   :  { %762 = vmatpush3.bf16.msra.mxu0 %v839_v51 }
  0x38   :  { %763 = vmatprep.subr.bf16.mxu0 %v840_v52 }
  0x3b   :  { %764 = vmatpush3.bf16.msra.mxu0 %v841_v53 }
  0x3c   :  { %765 = vmatprep.subr.bf16.mxu0 %v842_v54 }
  0x3f   :  { %766 = vmatpush3.bf16.msra.mxu0 %v843_v55 }
  0x42   :  { %549 = vmatmul.mubr.bf16.vlgmr.msra.gmra.mrb[4].mxu0 %v651_v56 }
  0xf5   :  { %v723_v62 = vpop.f32.mrb[0].mxu0 }
  0xf6   :  { %v724_v0 = vpop.f32.mrb[1].mxu0 }
  0xf7   :  { %v725_v1 = vadd.f32 %v724_v0, %v723_v62  ;;  %v726_v2 = vpop.f32.mrb[2].mxu0  ;;  %v745_v3 = vpop.f32.mrb[0].mxu1 }
  0xf8   :  { %v727_v4 = vpop.f32.mrb[3].mxu0  ;;  %v746_v5 = vpop.f32.mrb[1].mxu1 }
  0xf9   :  { %v471_v6 = vadd.f32 %v725_v1, %v646_v63  ;;  %v747_v7 = vadd.f32 %v746_v5, %v745_v3  ;;  %v748_v8 = vpop.f32.mrb[2].mxu1 }
  0xfa   :  { %v749_v9 = vpop.f32.mrb[3].mxu1 }
  0xfb   :  { %v511_v10 = vadd.f32 %v747_v7, %v471_v6 }
 0x115   :  { %v767_v11 = vpop.f32.mrb[4].mxu0 }
 0x116   :  { %v768_v12 = vpop.f32.mrb[5].mxu0 }
 0x117   :  { %v769_v13 = vadd.f32 %v768_v12, %v767_v11  ;;  %v770_v14 = vpop.f32.mrb[6].mxu0 }
 0x118   :  { %v771_v15 = vpop.f32.mrb[7].mxu0 }
 0x119   :  { %v551_v16 = vadd.f32 %v769_v13, %v511_v10 }
 0x11b   :  { %v556_v17 = vpack.c.bf16 %v551_v16, %v551_v16 }
 0x11d   :  { %787 = vmatmul.mubr.msk.bf16.vlgmr.msra.gmra.mrb[4].mxu1 %vm596_vm1, %v556_v17 }
 0x1f0   :  { %v634_v19 = vpop.f32.mrb[4].mxu1 }
 0x1f1   :  { %v635_v20 = vadd.f32 %v701_v18, %v634_v19  ;;  %v788_v21 = vpop.f32.mrb[5].mxu1 }
 0x1f2   :  { %v637_v22 = vpop.f32.mrb[6].mxu1 }
 0x1f3   :  { %641 = vst.msk [vmem:[%s1061_s5] sm:$0xff] %vm640_vm2, %v635_v20  ;;  %v789_v23 = vpop.f32.mrb[7].mxu1 }

// kernel: _lambda_.4
= control target key start
LH: loop header
LB: loop body
LE: loop exit
PB: predicated region body
PF: predicated region fallthrough
CT: control target
= control target key end

     0   :  { %vm123_vm0 = vcmask 64512   ;;  %v248_v0 = vmov 0.0   ;;  %vm249_vm1 = vmmov 0   ;;  %v250_v4 = vmov 0.0|0.0   ;;  %s310_s4 = inlined_call_operand.vmem [shape: f32[8,64], index: 4, kind: input, shape index: {}]   ;;  %s311_s3 = inlined_call_operand.vmem [shape: f32[2,8], index: 3, kind: input, shape index: {}]   ;;  %s312_s1 = inlined_call_operand.vmem [shape: f32[16,64], index: 1, kind: input, shape index: {}]   ;;  %s313_s0 = inlined_call_operand.vmem [shape: f32[2,16], index: 0, kind: input, shape index: {}]   ;;  %s314_s5 = inlined_call_operand.vmem [shape: f32[1,64], index: 5, kind: input, shape index: {}]   ;;  %s315_s2 = inlined_call_operand.vmem [shape: f32[1,64], index: 2, kind: input, shape index: {}]   ;;  %s316_s6 = inlined_call_operand.vmem [shape: f32[2,64], index: 6, kind: output, shape index: {}]  }
   0x1   :  { %229 = vmatprep.subr.mxu1 %v248_v0  ;;  %v115_v1 = vld [vmem:[%s310_s4] sm:$0xff]  ;;  %231 = vmatprep.mubr.msk.f32.mxu1 %vm249_vm1, %v248_v0  ;;  %v25_v5 = vld [vmem:[%s312_s1 + $0x8] sm:$0xff]  ;;  %vm33_vm2 = vcmask 130048   ;;  %vm205_vm3 = vcmask 517120  }
   0x2   :  { %v114_v2 = vld [vmem:[%s311_s3] sm:$0x3]  ;;  %230 = vmatpush3.msra.mxu1 %v115_v1  ;;  %234 = vmatprep.subr.bf16.mxu0 %v250_v4 }
   0x3   :  { %v24_v3 = vld [vmem:[%s312_s1] sm:$0xff]  ;;  %232 = vmatmul.mubr.msk.f32.vlgmr.msra.gmra.mrb[0].mxu1 %vm123_vm0, %v114_v2  ;;  %226 = vmatprep.mubr.msk.f32.mxu0 %vm249_vm1, %v248_v0 }
   0x4   :  { %v235_v6 = vpack.c.bf16 %v25_v5, %v24_v3  ;;  %v23_v7 = vld [vmem:[%s313_s0] sm:$0x3] }
   0x5   :  { %v214_v8 = vld [vmem:[%s314_s5] ss:$0 sm:$0xff] }
   0x6   :  { %236 = vmatpush3.bf16.msra.mxu0 %v235_v6  ;;  %v211_v13 = vld [vmem:[%s315_s2] ss:$0 sm:$0xff] }
   0x9   :  { %227 = vmatmul.mubr.msk.f32.vlgmr.msra.gmra.mrb[0].mxu0 %vm33_vm2, %v23_v7 }
  0xd6   :  { %v193_v9 = vpop.f32.mrb[0].mxu1 }
  0xd7   :  { %v194_v10 = vadd.f32 %v214_v8, %v193_v9  ;;  %v233_v11 = vpop.f32.mrb[1].mxu1 }
  0xd9   :  { %v216_v12 = vmul.f32 -1.442695, %v194_v10 }
  0xdb   :  { %240 = vpow2.f32 %v216_v12 }
  0xdc   :  { %v103_v14 = vpop.f32.mrb[0].mxu0 }
  0xdd   :  { %v104_v15 = vadd.f32 %v211_v13, %v103_v14  ;;  %v228_v16 = vpop.f32.mrb[1].mxu0 }
  0xdf   :  { %v213_v17 = vmul.f32 -1.442695, %v104_v15 }
  0xe1   :  { %242 = vpow2.f32 %v213_v17 }
  0xe5   :  { %v241_v18 = vpop.eup %240 }
  0xe6   :  { %v200_v19 = vadd.f32 1.0, %v241_v18 }
  0xe8   :  { %244 = vrcp.f32 %v200_v19 }
  0xeb   :  { %v243_v20 = vpop.eup %242 }
  0xec   :  { %v110_v21 = vadd.f32 1.0, %v243_v20 }
  0xee   :  { %246 = vrcp.f32 %v110_v21 }
  0xf2   :  { %v245_v22 = vpop.eup %244 }
  0xf3   :  { %v203_v24 = vmul.f32 %v245_v22, %v194_v10 }
  0xf8   :  { %v247_v23 = vpop.eup %246 }
  0xf9   :  { %v113_v25 = vmul.f32 %v247_v23, %v104_v15 }
  0xfb   :  { %v204_v26 = vadd.f32 %v203_v24, %v113_v25 }
  0xfd   :  { %206 = vst.msk [vmem:[%s316_s6] sm:$0x3] %vm205_vm3, %v204_v26 }

// kernel: _lambda_.5
= control target key start
LH: loop header
LB: loop body
LE: loop exit
PB: predicated region body
PF: predicated region fallthrough
CT: control target
= control target key end

     0   :  { %13 = vsyncpa [#allocation3], 0  ;;  %s1798_s27 = smov 0   ;;  %s1800_s28 = smov 0   ;;  %s2138_s0 = inlined_call_operand.vmem [shape: f32[2], index: 0, kind: input, shape index: {}]   ;;  %s2139_s1 = inlined_call_operand.vmem [shape: f32[2,4,768], index: 1, kind: input, shape index: {}]   ;;  %s2140_s2 = inlined_call_operand.vmem [shape: f32[2,4,768], index: 2, kind: input, shape index: {}]   ;;  %s2141_s3 = inlined_call_operand.vmem [shape: f32[2,1,64], index: 3, kind: input, shape index: {}]   ;;  %s2142_s4 = inlined_call_operand.vmem [shape: bf16[768,64], index: 4, kind: input, shape index: {}]   ;;  %s2143_s5 = inlined_call_operand.vmem [shape: f32[1,64], index: 5, kind: input, shape index: {}]   ;;  %s2144_s6 = inlined_call_operand.vmem [shape: bf16[64,768], index: 6, kind: input, shape index: {}]   ;;  %s2145_s7 = inlined_call_operand.vmem [shape: f32[1,768], index: 7, kind: input, shape index: {}]   ;;  %s2146_s8 = inlined_call_operand.vmem [shape: f32[2,8,128], index: 8, kind: output, shape index: {}]  }
   0x1   :  { %s1802_s29 = smov 0  }
   0x2 LB: > { %s1425_s30 = sadd.s32 4294967295, %s1749_s29   ;;  %s31_s9 = sadd.s32 1, %s1745_s28  ;;  %s1749_s29 = sphi %s1802_s29, %s19_s29   ;;  %s1745_s28 = sphi %s1800_s28, %s2150_s28   ;;  %s1741_s27 = sphi %s1798_s27, %s2149_s27  }
   0x3   : > { %p33_p0 = scmp.ge.s32.totalorder %s31_s9, 2  ;;  %p1427_p1 = scmp.ge.s32.totalorder %s1749_s29, 1 }
   0x4   : > { %p251_p2 = scmp.lt.s32.totalorder %s1749_s29, 3  ;;  %p1823_p4 = scmp.eq.s32.totalorder %s1425_s30, 0 }
   0x5   : > { %s2152_s9 = smov (%p33_p0, %s31_s9), 0  ;;  %s264_s14 = sshll.u32 %s2138_s0, 4  ;;  %s265_s14 = int_to_ptr.vmem [resolvable:$true] %s264_s14 }
   0x6   : > { %p1819_p3 = pnand %p1427_p1, %p251_p2  ;;  %s1708_s15 = scalar_lea.vmem %s265_s14, 16 }
   0x7   : > { %p1709_p7 = scmp.ne.s32.totalorder %s265_s14, %s1708_s15  ;;  %p1716_p11 = scmp.lt.s32.totalorder %s265_s14, %s265_s14 }
   0x8   : > { %p1588_p5 = pneg %p1819_p3  ;;  %p1717_p12 = scmp.lt.s32.totalorder %s1708_s15, %s1708_s15 }
   0xa   : > { %p1589_p6 = pnand %p1823_p4, %p1588_p5  ;;  %p1718_p13 = por %p1717_p12, %p1716_p11 }
   0xc   : > { %p1710_p8 = pneg %p1589_p6 }
   0xe   : > { %p1711_p9 = pnand %p1710_p8, %p1709_p7 }
  0x10   : > { %p1712_p10 = pneg %p1711_p9 }
  0x12   : > { %p1719_p0 = pnand %p1718_p13, %p1712_p10 }
  0x14   : > { %1722 = shalt.err (!%p1719_p0)
}
  0x15   : > { %s1751_s16 = smov [#allocation2]   ;;  %319 = sbr.rel (%p1819_p3) target bundleno = 794 (0x31a), region = 52 }
  0x16   : > { %1591 = dma.vmem_to_smem (!%p1589_p6), %s265_s14, 16, %s1751_s16, [#allocation3]  }
  0x1c   : > { %1736 = dma.done.wait (%p1823_p4), [#allocation3], 16  }
  0x1d   : > { %1738 = vsyncadd (%p1823_p4), [#allocation3], 4294967280 }
  0x1e   : > { %325 = sfence }
  0x1f   : > { %v1620_v0 = vld [vmem:[%s2142_s4 + $0x40] sm:$0xff]   ;;  %v1624_v4 = vld [vmem:[%s2142_s4 + $0x48] sm:$0xff]   ;;  %v1628_v8 = vld [vmem:[%s2142_s4 + $0x50] sm:$0xff]   ;;  %p370_p1 = scmp.lt.s32.totalorder %s1741_s27, 1  ;;  %s1896_s17 = sld [smem:[#allocation2 + %s1741_s27]]  ;;  %vm1138_vm0 = vcmask 523264  }
  0x20   : > { %v1621_v1 = vld [vmem:[%s2142_s4] sm:$0xff]   ;;  %1515 = vmatprep.subr.bf16.mxu0 %v1620_v0  ;;  %v1625_v5 = vld [vmem:[%s2142_s4 + $0x8] sm:$0xff]   ;;  %v1629_v9 = vld [vmem:[%s2142_s4 + $0x10] sm:$0xff]   ;;  %vm1286_vm1 = vcmask 1043456  }
  0x21   : > { %v1622_v2 = vld [vmem:[%s2142_s4 + $0xc0] sm:$0xff]   ;;  %1516 = vmatpush3.bf16.msra.mxu0 %v1621_v1  ;;  %v1626_v6 = vld [vmem:[%s2142_s4 + $0xc8] sm:$0xff]   ;;  %v1630_v10 = vld [vmem:[%s2142_s4 + $0xd0] sm:$0xff]   ;;  %s2154_s27 = smov (!%p370_p1, %s1741_s27), 1 }
  0x22   : > { %v1623_v3 = vld [vmem:[%s2142_s4 + $0x80] sm:$0xff]   ;;  %1537 = vmatprep.subr.bf16.mxu1 %v1622_v2  ;;  %1517 = vmatprep.subr.bf16.mxu0 %v1624_v4  ;;  %v1627_v7 = vld [vmem:[%s2142_s4 + $0x88] sm:$0xff]   ;;  %v1631_v11 = vld [vmem:[%s2142_s4 + $0x90] sm:$0xff]   ;;  %s1581_s14 = smul.u32 24, %s2154_s27 }
  0x23   : > { %1538 = vmatpush3.bf16.msra.mxu1 %v1623_v3  ;;  %v1632_v12 = vld [vmem:[%s2142_s4 + $0x58] sm:$0xff]   ;;  %v1636_v16 = vld [vmem:[%s2142_s4 + $0x60] sm:$0xff]   ;;  %v1640_v20 = vld [vmem:[%s2142_s4 + $0x68] sm:$0xff]  }
  0x24   : > { %1539 = vmatprep.subr.bf16.mxu1 %v1626_v6  ;;  %v1633_v13 = vld [vmem:[%s2142_s4 + $0x18] sm:$0xff]   ;;  %v1637_v17 = vld [vmem:[%s2142_s4 + $0x20] sm:$0xff]   ;;  %v1641_v21 = vld [vmem:[%s2142_s4 + $0x28] sm:$0xff]   ;;  %s1939_s30 = scalar_lea.vmem %s2139_s1, %s1581_s14  ;;  %s1944_s12 = scalar_lea.vmem %s2140_s2, %s1581_s14 }
  0x25   : > { %1518 = vmatpush3.bf16.msra.mxu0 %v1625_v5  ;;  %v1634_v14 = vld [vmem:[%s2142_s4 + $0xd8] sm:$0xff]   ;;  %v1638_v18 = vld [vmem:[%s2142_s4 + $0xe0] sm:$0xff]   ;;  %v1642_v22 = vld [vmem:[%s2142_s4 + $0xe8] sm:$0xff]   ;;  %s405_s18 = ssub.f32 1.0, %s1896_s17  ;;  %v410_v29 = vstv %s1896_s17  ;;  %s1434_s14 = sshll.u32 %s2154_s27, 3 }
  0x26   : > { %1519 = vmatprep.subr.bf16.mxu0 %v1628_v8  ;;  %v1635_v15 = vld [vmem:[%s2142_s4 + $0x98] sm:$0xff]   ;;  %v1639_v19 = vld [vmem:[%s2142_s4 + $0xa0] sm:$0xff]   ;;  %v1643_v23 = vld [vmem:[%s2142_s4 + $0xa8] sm:$0xff]   ;;  %s395_s21 = scalar_lea.vmem %s2146_s8, %s1434_s14 }
  0x27   : > { %1540 = vmatpush3.bf16.msra.mxu1 %v1627_v7  ;;  %v1644_v24 = vld [vmem:[%s2142_s4 + $0x70] sm:$0xff]   ;;  %v1648_v28 = vld [vmem:[%s2142_s4 + $0x78] sm:$0xff]   ;;  %v406_v31 = vstv %s405_s18  ;;  %v1954_v33 = vld [vmem:[%s1939_s30] sm:$0xff]  ;;  %s390_s18 = scalar_lea.vmem %s2141_s3, %s2154_s27 }
  0x28   : > { %1541 = vmatprep.subr.bf16.mxu1 %v1630_v10  ;;  %v1645_v25 = vld [vmem:[%s2142_s4 + $0x30] sm:$0xff]   ;;  %v1649_v30 = vld [vmem:[%s2142_s4 + $0x38] sm:$0xff]   ;;  %v1957_v34 = vld [vmem:[%s1944_s12] sm:$0xff]  ;;  %v407_v35 = vmul.f32 %v406_v31, %v1954_v33 }
  0x29   : > { %1520 = vmatpush3.bf16.msra.mxu0 %v1629_v9  ;;  %v1646_v26 = vld [vmem:[%s2142_s4 + $0xf0] sm:$0xff]   ;;  %v1650_v32 = vld [vmem:[%s2142_s4 + $0xf8] sm:$0xff]   ;;  %v411_v36 = vmul.f32 %v410_v29, %v1957_v34  ;;  %v1652_v38 = vld [vmem:[%s2142_s4 + $0x140] sm:$0xff]  }
  0x2a   : > { %1521 = vmatprep.subr.bf16.mxu0 %v1632_v12  ;;  %v1647_v27 = vld [vmem:[%s2142_s4 + $0xb0] sm:$0xff]   ;;  %v1651_v37 = vld [vmem:[%s2142_s4 + $0xb8] sm:$0xff]   ;;  %v1968_v39 = vld [vmem:[%s1939_s30 + $0x8] sm:$0xff] }
  0x2b   : > { %1542 = vmatpush3.bf16.msra.mxu1 %v1631_v11  ;;  %v414_v40 = vadd.f32 %v411_v36, %v407_v35  ;;  %v1971_v41 = vld [vmem:[%s1944_s12 + $0x8] sm:$0xff]  ;;  %v408_v42 = vmul.f32 %v406_v31, %v1968_v39  ;;  %v1653_v48 = vld [vmem:[%s2142_s4 + $0x100] sm:$0xff]   ;;  %v1656_v54 = vld [vmem:[%s2142_s4 + $0x150] sm:$0xff]  }
  0x2c   : > { %1543 = vmatprep.subr.bf16.mxu1 %v1634_v14  ;;  %v412_v43 = vmul.f32 %v410_v29, %v1971_v41  ;;  %v1654_v50 = vld [vmem:[%s2142_s4 + $0x148] sm:$0xff]   ;;  %v1657_v55 = vld [vmem:[%s2142_s4 + $0x110] sm:$0xff]   ;;  %v1658_v56 = vld [vmem:[%s2142_s4 + $0x158] sm:$0xff]  }
  0x2d   : > { %1522 = vmatpush3.bf16.msra.mxu0 %v1633_v13  ;;  %v423_v44 = vcombine.high %v414_v40, %v414_v40  ;;  %v429_v45 = vpack.c.bf16 %v414_v40, %v414_v40  ;;  %v1655_v53 = vld [vmem:[%s2142_s4 + $0x108] sm:$0xff]   ;;  %v1659_v57 = vld [vmem:[%s2142_s4 + $0x118] sm:$0xff]   ;;  %v1660_v58 = vld [vmem:[%s2142_s4 + $0x160] sm:$0xff]  }
  0x2e   : > { %1523 = vmatprep.subr.bf16.mxu0 %v1636_v16  ;;  %v415_v46 = vadd.f32 %v412_v43, %v408_v42  ;;  %v2000_v59 = vld [vmem:[%s1939_s30 + $0x10] sm:$0xff]  ;;  %v1661_v63 = vld [vmem:[%s2142_s4 + $0x120] sm:$0xff]   ;;  %v1662_v1 = vld [vmem:[%s2142_s4 + $0x168] sm:$0xff]  }
  0x2f   : > { %1544 = vmatpush3.bf16.msra.mxu1 %v1635_v15  ;;  %v430_v47 = vpack.c.bf16 %v423_v44, %v423_v44  ;;  %v2003_v60 = vld [vmem:[%s1944_s12 + $0x10] sm:$0xff]  ;;  %v409_v61 = vmul.f32 %v406_v31, %v2000_v59  ;;  %v1663_v4 = vld [vmem:[%s2142_s4 + $0x128] sm:$0xff]   ;;  %v1666_v7 = vld [vmem:[%s2142_s4 + $0x178] sm:$0xff]  }
  0x30   : > { %1545 = vmatprep.subr.bf16.mxu1 %v1638_v18  ;;  %v424_v49 = vcombine.high %v415_v46, %v415_v46  ;;  %v431_v51 = vpack.c.bf16 %v415_v46, %v415_v46  ;;  %v413_v62 = vmul.f32 %v410_v29, %v2003_v60  ;;  %v1664_v5 = vld [vmem:[%s2142_s4 + $0x170] sm:$0xff]   ;;  %v1667_v8 = vld [vmem:[%s2142_s4 + $0x138] sm:$0xff]   ;;  %v1435_v29 = vld [vmem:[%s2143_s5] ss:$0 sm:$0xff] }
  0x31   : > { %1524 = vmatpush3.bf16.msra.mxu0 %v1637_v17  ;;  %858 = vmatprep.mubr.bf16.mxu0 %v430_v47  ;;  %v1665_v6 = vld [vmem:[%s2142_s4 + $0x130] sm:$0xff]   ;;  %v1670_v10 = vld [vmem:[%s2144_s6 + $0x4] ss:$24 sps:$4 sm:$0xff]   ;;  %v1668_v11 = vld [vmem:[%s2144_s6] ss:$24 sps:$4 sm:$0xff]  }
  0x32   : > { %1525 = vmatprep.subr.bf16.mxu0 %v1640_v20  ;;  %v432_v52 = vpack.c.bf16 %v424_v49, %v424_v49  ;;  %v416_v0 = vadd.f32 %v413_v62, %v409_v61  ;;  %v1673_v12 = vld [vmem:[%s2144_s6 + $0x14] ss:$24 sps:$4 sm:$0xff]   ;;  %v1671_v13 = vld [vmem:[%s2144_s6 + $0x10] ss:$24 sps:$4 sm:$0xff]   ;;  %v1679_v16 = vld [vmem:[%s2144_s6 + $0x44] ss:$24 sps:$4 sm:$0xff]  }
  0x33   : > { %1546 = vmatpush3.bf16.msra.mxu1 %v1639_v19  ;;  %v1676_v14 = vld [vmem:[%s2144_s6 + $0x34] ss:$24 sps:$4 sm:$0xff]   ;;  %v1674_v15 = vld [vmem:[%s2144_s6 + $0x30] ss:$24 sps:$4 sm:$0xff]   ;;  %v1677_v17 = vld [vmem:[%s2144_s6 + $0x40] ss:$24 sps:$4 sm:$0xff]  }
  0x34   : > { %1547 = vmatprep.subr.bf16.mxu1 %v1642_v22  ;;  %898 = vmatprep.mubr.bf16.mxu1 %v432_v52  ;;  %v425_v2 = vcombine.high %v416_v0, %v416_v0  ;;  %v433_v9 = vpack.c.bf16 %v416_v0, %v416_v0  ;;  %v1682_v18 = vld [vmem:[%s2144_s6 + $0x64] ss:$24 sps:$4 sm:$0xff]   ;;  %v1680_v19 = vld [vmem:[%s2144_s6 + $0x60] ss:$24 sps:$4 sm:$0xff]   ;;  %v1685_v20 = vld [vmem:[%s2144_s6 + $0x74] ss:$24 sps:$4 sm:$0xff]  }
  0x35   : > { %1526 = vmatpush3.bf16.msra.mxu0 %v1641_v21  ;;  %v1683_v21 = vld [vmem:[%s2144_s6 + $0x70] ss:$24 sps:$4 sm:$0xff]   ;;  %v1688_v22 = vld [vmem:[%s2144_s6 + $0x94] ss:$24 sps:$4 sm:$0xff]   ;;  %v1484_v49 = vld [vmem:[%s390_s18] ss:$0 sm:$0xff] }
  0x36   : > { %1527 = vmatprep.subr.bf16.mxu0 %v1644_v24  ;;  %v434_v3 = vpack.c.bf16 %v425_v2, %v425_v2  ;;  %v1691_v24 = vld [vmem:[%s2144_s6 + $0xa4] ss:$24 sps:$4 sm:$0xff]  }
  0x37   : > { %1548 = vmatpush3.bf16.msra.mxu1 %v1643_v23  ;;  %v1686_v23 = vld [vmem:[%s2144_s6 + $0x90] ss:$24 sps:$4 sm:$0xff]   ;;  %v1697_v62 = vld [vmem:[%s2144_s6 + $0x3c] ss:$24 sps:$4 sm:$0xff]   ;;  %v1700_v0 = vld [vmem:[%s2144_s6 + $0x6c] ss:$24 sps:$4 sm:$0xff]  }
  0x38   : > { %1549 = vmatprep.subr.bf16.mxu1 %v1646_v26  ;;  %v1694_v26 = vld [vmem:[%s2144_s6 + $0xc] ss:$24 sps:$4 sm:$0xff]   ;;  %v1703_v2 = vld [vmem:[%s2144_s6 + $0x9c] ss:$24 sps:$4 sm:$0xff]  }
  0x39   : > { %1528 = vmatpush3.bf16.msra.mxu0 %v1645_v25  ;;  %v1689_v25 = vld [vmem:[%s2144_s6 + $0xa0] ss:$24 sps:$4 sm:$0xff]  }
  0x3a   : > { %1529 = vmatprep.subr.bf16.mxu0 %v1648_v28 }
  0x3b   : > { %1550 = vmatpush3.bf16.msra.mxu1 %v1647_v27  ;;  %v1752_v27 = vmov 0  }
  0x3c   : > { %1551 = vmatprep.subr.bf16.mxu1 %v1650_v32 }
  0x3d   : > { %1530 = vmatpush3.bf16.msra.mxu0 %v1649_v30 }
  0x3e   : > { %1559 = vmatprep.subr.bf16.mxu0 %v1652_v38 }
  0x3f   : > { %1552 = vmatpush3.bf16.msra.mxu1 %v1651_v37 }
  0x40   : > { %859 = vmatmul.mubr.bf16.vlgmr.msra.gmra.mrb[0].mxu0 %v429_v45  ;;  %1142 = vmatprep.subr.bf16.mxu1 %v1670_v10 }
  0x41   : > { %1560 = vmatpush3.bf16.msra.mxu0 %v1653_v48  ;;  %938 = vmatprep.mubr.bf16.mxu0 %v434_v3  ;;  %v1701_v3 = vld [vmem:[%s2144_s6 + $0x98] ss:$24 sps:$4 sm:$0xff]  }
  0x42   : > { %1561 = vmatprep.subr.bf16.mxu0 %v1654_v50  ;;  %899 = vmatmul.mubr.bf16.vlgmr.msra.gmra.mrb[0].mxu1 %v431_v51 }
  0x43   : > { %1143 = vmatpush1.bf16.msra.mxu1 %v1668_v11  ;;  %1174 = vmatprep.mubr.bf16.mxu1 %v1752_v27 }
  0x44   : > { %1144 = vmatprep.subr.bf16.mxu1 %v1676_v14 }
  0x45   : > { %1562 = vmatpush3.bf16.msra.mxu0 %v1655_v53 }
  0x46   : > { %1563 = vmatprep.subr.bf16.mxu0 %v1656_v54 }
  0x47   : > { %1145 = vmatpush1.bf16.msra.mxu1 %v1674_v15 }
  0x48   : > { %1146 = vmatprep.subr.bf16.mxu1 %v1682_v18 }
  0x49   : > { %1564 = vmatpush3.bf16.msra.mxu0 %v1657_v55 }
  0x4a   : > { %1565 = vmatprep.subr.bf16.mxu0 %v1658_v56 }
  0x4b   : > { %1147 = vmatpush1.bf16.msra.mxu1 %v1680_v19 }
  0x4c   : > { %1148 = vmatprep.subr.bf16.mxu1 %v1688_v22 }
  0x4d   : > { %1566 = vmatpush3.bf16.msra.mxu0 %v1659_v57 }
  0x4e   : > { %1567 = vmatprep.subr.bf16.mxu0 %v1660_v58  ;;  %v1692_v58 = vld [vmem:[%s2144_s6 + $0x8] ss:$24 sps:$4 sm:$0xff]  }
  0x4f   : > { %1149 = vmatpush1.bf16.msra.mxu1 %v1686_v23 }
  0x50   : > { %1183 = vmatprep.subr.bf16.mxu1 %v1694_v26 }
  0x51   : > { %1568 = vmatpush3.bf16.msra.mxu0 %v1661_v63  ;;  %v1695_v63 = vld [vmem:[%s2144_s6 + $0x38] ss:$24 sps:$4 sm:$0xff]  }
  0x52   : > { %1569 = vmatprep.subr.bf16.mxu0 %v1662_v1  ;;  %v1698_v1 = vld [vmem:[%s2144_s6 + $0x68] ss:$24 sps:$4 sm:$0xff]  }
  0x55   : > { %1570 = vmatpush3.bf16.msra.mxu0 %v1663_v4  ;;  %v988_v4 = vlaneseq }
  0x56   : > { %1571 = vmatprep.subr.bf16.mxu0 %v1664_v5 }
  0x57   : > { %v989_v5 = vshrl.u32 %v988_v4, 7 }
  0x59   : > { %1572 = vmatpush3.bf16.msra.mxu0 %v1665_v6  ;;  %v990_v6 = vsub.s32 0, %v989_v5 }
  0x5a   : > { %1573 = vmatprep.subr.bf16.mxu0 %v1666_v7  ;;  %v986_v7 = vld [vmem:[%s2145_s7] sm:$0x3f] }
  0x5b   : > { %v991_v10 = vrot.slane %v986_v7, %v990_v6 }
  0x5d   : > { %1574 = vmatpush3.bf16.msra.mxu0 %v1667_v8  ;;  %v994_v8 = vsub.s32 1, %v989_v5 }
  0x5e   : > { %1224 = vmatprep.subr.bf16.mxu0 %v1673_v12 }
  0x5f   : > { %v995_v11 = vrot.slane %v986_v7, %v994_v8 }
  0x60   : > { %939 = vmatmul.mubr.bf16.vlgmr.msra.gmra.mrb[4].mxu0 %v433_v9  ;;  %v417_v9 = vsub.f32 %v1957_v34, %v1954_v33  ;;  %v1006_v34 = vsub.s32 4, %v989_v5 }
  0x61   : > { %1225 = vmatpush1.bf16.msra.mxu0 %v1671_v13  ;;  %1256 = vmatprep.mubr.bf16.mxu0 %v1752_v27 }
  0x62   : > { %1226 = vmatprep.subr.bf16.mxu0 %v1679_v16  ;;  %v1268_v14 = vcombine.high %v417_v9, %v417_v9 }
  0x65   : > { %1227 = vmatpush1.bf16.msra.mxu0 %v1677_v17 }
  0x66   : > { %1228 = vmatprep.subr.bf16.mxu0 %v1685_v20 }
  0x69   : > { %1229 = vmatpush1.bf16.msra.mxu0 %v1683_v21 }
  0x6a   : > { %1230 = vmatprep.subr.bf16.mxu0 %v1691_v24 }
  0x6d   : > { %1231 = vmatpush1.bf16.msra.mxu0 %v1689_v25 }
 0x113   : > { %v1531_v28 = vpop.f32.mrb[0].mxu0 }
 0x114   : > { %v1532_v30 = vpop.f32.mrb[1].mxu0 }
 0x115   : > { %v1533_v31 = vadd.f32 %v1532_v30, %v1531_v28  ;;  %v1534_v32 = vpop.f32.mrb[2].mxu0  ;;  %v1553_v35 = vpop.f32.mrb[0].mxu1  ;;  %v998_v30 = vsub.s32 2, %v989_v5 }
 0x116   : > { %v1535_v36 = vpop.f32.mrb[3].mxu0  ;;  %v1554_v38 = vpop.f32.mrb[1].mxu1  ;;  %v1007_v32 = vrot.slane %v986_v7, %v1006_v34 }
 0x117   : > { %v861_v37 = vadd.f32 %v1533_v31, %v1435_v29  ;;  %v1555_v40 = vadd.f32 %v1554_v38, %v1553_v35  ;;  %v1556_v42 = vpop.f32.mrb[2].mxu1  ;;  %v1010_v29 = vsub.s32 5, %v989_v5  ;;  %v1002_v31 = vsub.s32 3, %v989_v5 }
 0x118   : > { %v1557_v43 = vpop.f32.mrb[3].mxu1  ;;  %v418_v35 = vsub.f32 %v1971_v41, %v1968_v39  ;;  %v419_v36 = vsub.f32 %v2003_v60, %v2000_v59  ;;  %v999_v38 = vrot.slane %v986_v7, %v998_v30 }
 0x119   : > { %v901_v44 = vadd.f32 %v1555_v40, %v861_v37  ;;  %v1011_v37 = vrot.slane %v986_v7, %v1010_v29  ;;  %v1003_v40 = vrot.slane %v986_v7, %v1002_v31 }
 0x133   : > { %v1575_v45 = vpop.f32.mrb[4].mxu0 }
 0x134   : > { %v1576_v46 = vpop.f32.mrb[5].mxu0 }
 0x135   : > { %v1577_v47 = vadd.f32 %v1576_v46, %v1575_v45  ;;  %v1578_v48 = vpop.f32.mrb[6].mxu0  ;;  %v1270_v46 = vcombine.high %v419_v36, %v419_v36 }
 0x136   : > { %v1579_v50 = vpop.f32.mrb[7].mxu0 }
 0x137   : > { %v941_v51 = vadd.f32 %v1577_v47, %v901_v44  ;;  %v1269_v44 = vcombine.high %v418_v35, %v418_v35 }
 0x139   : > { %v953_v52 = vadd.f32 %v1484_v49, %v941_v51 }
 0x13b   : > { %v1485_v53 = vmul.f32 -1.442695, %v953_v52 }
 0x13d   : > { %1704 = vpow2.f32 %v1485_v53 }
 0x147   : > { %v1705_v54 = vpop.eup %1704 }
 0x148   : > { %v957_v55 = vadd.f32 1.0, %v1705_v54 }
 0x14a   : > { %1706 = vrcp.f32 %v957_v55 }
 0x154   : > { %v1707_v56 = vpop.eup %1706 }
 0x155   : > { %v960_v57 = vmul.f32 %v1707_v56, %v953_v52 }
 0x157   : > { %v961_v61 = vpack.c.bf16 %v960_v57, %v960_v57 }
 0x159   : > { %1510 = vmatmul.mubr.msk.bf16.vlgmr.msra.gmra.mrb[4].mxu1 %vm1138_vm0, %v961_v61  ;;  %1512 = vmatmul.mubr.msk.bf16.vlgmr.msra.gmra.mrb[8].mxu0 %vm1138_vm0, %v961_v61 }
 0x15a   : > { %1184 = vmatpush1.bf16.msra.mxu1 %v1692_v58  ;;  %1215 = vmatprep.mubr.bf16.mxu1 %v1752_v27 }
 0x15b   : > { %1185 = vmatprep.subr.bf16.mxu1 %v1697_v62 }
 0x15e   : > { %1186 = vmatpush1.bf16.msra.mxu1 %v1695_v63 }
 0x15f   : > { %1187 = vmatprep.subr.bf16.mxu1 %v1700_v0 }
 0x162   : > { %1188 = vmatpush1.bf16.msra.mxu1 %v1698_v1 }
 0x163   : > { %1189 = vmatprep.subr.bf16.mxu1 %v1703_v2 }
 0x166   : > { %1190 = vmatpush1.bf16.msra.mxu1 %v1701_v3 }
 0x169   : > { %1511 = vmatmul.mubr.msk.bf16.vlgmr.msra.gmra.mrb[8].mxu1 %vm1138_vm0, %v961_v61 }
 0x22c   : > { %v1176_v12 = vpop.f32.mrb[4].mxu1  ;;  %v1258_v13 = vpop.f32.mrb[8].mxu0 }
 0x22d   : > { %v1177_v15 = vadd.f32 %v1176_v12, %v991_v10  ;;  %v1178_v16 = vpop.f32.mrb[5].mxu1  ;;  %v1260_v17 = vpop.f32.mrb[9].mxu0  ;;  %v1259_v42 = vadd.f32 %v1258_v13, %v1007_v32 }
 0x22e   : > { %v1179_v18 = vadd.f32 %v1178_v16, %v995_v11  ;;  %v1180_v19 = vpop.f32.mrb[6].mxu1  ;;  %v1262_v20 = vpop.f32.mrb[10].mxu0  ;;  %v1261_v45 = vadd.f32 %v1260_v17, %v1011_v37 }
 0x22f   : > { %v1274_v21 = vsub.f32 %v1177_v15, %v417_v9  ;;  %v1181_v22 = vpop.f32.mrb[7].mxu1  ;;  %v1263_v23 = vpop.f32.mrb[11].mxu0  ;;  %v1278_v51 = vsub.f32 %v1259_v42, %v419_v36 }
 0x230   : > { %v1275_v24 = vsub.f32 %v1179_v18, %v1268_v14  ;;  %v1279_v39 = vsub.f32 %v1261_v45, %v1270_v46 }
 0x231   : > { %v1280_v25 = vmul.f32 %v1274_v21, %v1274_v21  ;;  %v1284_v59 = vmul.f32 %v1278_v51, %v1278_v51 }
 0x232   : > { %v1281_v26 = vmul.f32 %v1275_v24, %v1275_v24  ;;  %v1285_v58 = vmul.f32 %v1279_v39, %v1279_v39 }
 0x233   : > { %v1287_v33 = vsel %vm1286_vm1, %v1280_v25, 0.0  ;;  %v1294_v62 = vsel %vm1286_vm1, %v1284_v59, 0.0 }
 0x234   : > { %v1288_v27 = vsel %vm1286_vm1, %v1281_v26, 0.0  ;;  %v1296_v0 = vsel %vm1286_vm1, %v1285_v58, 0.0 }
 0x235   : > { %v1289_v28 = vadd.f32 %v1288_v27, %v1287_v33 }
 0x23c   : > { %v1217_v43 = vpop.f32.mrb[8].mxu1 }
 0x23d   : > { %v1218_v47 = vadd.f32 %v1217_v43, %v999_v38  ;;  %v1219_v48 = vpop.f32.mrb[9].mxu1 }
 0x23e   : > { %v1220_v49 = vadd.f32 %v1219_v48, %v1003_v40  ;;  %v1221_v50 = vpop.f32.mrb[10].mxu1 }
 0x23f   : > { %v1276_v52 = vsub.f32 %v1218_v47, %v418_v35  ;;  %v1222_v53 = vpop.f32.mrb[11].mxu1 }
 0x240   : > { %v1277_v54 = vsub.f32 %v1220_v49, %v1269_v44 }
 0x241   : > { %v1282_v41 = vmul.f32 %v1276_v52, %v1276_v52 }
 0x242   : > { %v1283_v55 = vmul.f32 %v1277_v54, %v1277_v54 }
 0x243   : > { %v1290_v60 = vsel %vm1286_vm1, %v1282_v41, 0.0 }
 0x244   : > { %v1291_v56 = vadd.f32 %v1290_v60, %v1289_v28  ;;  %v1292_v57 = vsel %vm1286_vm1, %v1283_v55, 0.0 }
 0x246   : > { %v1293_v61 = vadd.f32 %v1292_v57, %v1291_v56 }
 0x248   : > { %v1295_v63 = vadd.f32 %v1294_v62, %v1293_v61 }
 0x24a   : > { %v1297_v1 = vadd.f32 %v1296_v0, %v1295_v63 }
 0x24c   : > { %1298 = vadd.xlane.f32.xlu0 %v1297_v1 }
 0x2d9   : > { %v1299_v2 = vpop.xlane.xlu0 %1298 }
 0x2da   : > { %v1300_v3 = vrot.slane %v1299_v2, 4 }
 0x2dc   : > { %v1301_v4 = vadd.f32 %v1300_v3, %v1299_v2 }
 0x2de   : > { %v1302_v5 = vrot.slane %v1301_v4, 2 }
 0x2e0   : > { %v1303_v6 = vadd.f32 %v1302_v5, %v1301_v4 }
 0x2e2   : > { %v1304_v7 = vrot.slane %v1303_v6, 1 }
 0x2e4   : > { %v1305_v8 = vadd.f32 %v1304_v7, %v1303_v6 }
 0x2e6   : > { %1582 = vpush %v1305_v8 }
 0x317   : > { %s1583_s22 = spop %1582 }
 0x318   : > { %v1307_v9 = vstv %s1583_s22 }
 0x319   : > { %1308 = vst [vmem:[%s395_s21] sm:$0xff] %v1307_v9 }
 0x31a PF: > { %s19_s29 = sadd.s32 1, %s1749_s29   ;;  %s2149_s27 = smov %s1745_s28 }
 0x31b   : > { %p16_p2 = scmp.ge.s32.totalorder %s19_s29, 4   ;;  %s2150_s28 = smov %s2152_s9 }
 0x31d   :  { %18 = sbr.rel (!%p16_p2) target bundleno = 2 (0x2), region = 93 }
 0x324   :  { %1331 = vsyncpa [#allocation3], 1 }
 0x325   :  { %1333 = vsyncpa [#allocation3 + $0x1], 1 }

</bundles_post_ra>
